<compile_context>
chip_gen: v6e
topology: v6e:2x2x1
jax: 0.10.0
libtpu: 0.0.40
codegen_flags: <defaults>
</compile_context>

<pallas_src>
import math

import jax
import jax.numpy as jnp
from jax.experimental import pallas as pl
from jax.experimental.pallas import tpu as pltpu


def _hash_u32(x):
    """murmur3-style finalizer; pure VPU bit ops (portable, deterministic)."""
    x = x ^ (x >> jnp.uint32(16))
    x = x * jnp.uint32(0x7FEB352D)
    x = x ^ (x >> jnp.uint32(15))
    x = x * jnp.uint32(0x846CA68B)
    x = x ^ (x >> jnp.uint32(16))
    return x


def _random_explorer_kernel(seed_ref, action_ref, logp_ref):
    """Gumbel-max sample from a uniform categorical; one-hot + constant logp."""
    B, A = action_ref.shape

    lane = jax.lax.broadcasted_iota(jnp.int32, (B, A), 1)
    row = jax.lax.broadcasted_iota(jnp.int32, (B, A), 0)

    # --- counter-based PRNG: hash(seed, row, lane) -> uniform(0,1) -> Gumbel ---
    x = (row.astype(jnp.uint32) * jnp.uint32(0x9E3779B9)
         + lane.astype(jnp.uint32) * jnp.uint32(0x85EBCA6B)
         + seed_ref[0].astype(jnp.uint32) * jnp.uint32(0xC2B2AE35)
         + jnp.uint32(0x27220A95))
    bits = _hash_u32(x)
    u = (bits >> jnp.uint32(8)).astype(jnp.float32) * jnp.float32(1.0 / (1 << 24))
    eps = jnp.float32(1e-20)
    gumbel = -jnp.log(-jnp.log(u + eps) + eps)

    # Mixed logits are the constant log(1/A) (zero logits -> uniform softmax ->
    # unimix leaves it uniform); adding a constant does not change the argmax,
    # so the scores are just the Gumbel noise.  (Saves the softmax max/exp/sum
    # reductions and the reciprocal entirely.)
    scores = gumbel

    # --- Gumbel-max categorical sample (first argmax via masked min over iota) --
    best = jnp.max(scores, axis=-1, keepdims=True)
    cand = jnp.where(scores >= best, lane, jnp.int32(A))
    idx = jnp.min(cand, axis=-1, keepdims=True)        # always in [0, A-1]

    one_hot = (lane == idx).astype(jnp.float32)        # F.one_hot(...).float()
    action_ref[...] = one_hot
    # log-prob of the sampled index under the (uniform) mixed categorical.
    logp_ref[...] = jnp.full((B, 1), math.log(1.0 / A), jnp.float32)


def random_explorer_sample(seed, *, batch=1, action_dim=8,
                           temperature=1.0, unimix=0.01):
    """Sample `batch` random one-hot actions + log-probs in a single kernel call."""
    # Zero logits => softmax/temperature/unimix constant-fold to uniform; the
    # parameters are kept in the signature for interface fidelity only.
    del temperature, unimix
    seed_arr = jnp.asarray([seed], jnp.int32)

    action, logp = pl.pallas_call(
        _random_explorer_kernel,
        out_shape=(
            jax.ShapeDtypeStruct((batch, action_dim), jnp.float32),
            jax.ShapeDtypeStruct((batch, 1), jnp.float32),
        ),
        in_specs=[pl.BlockSpec(memory_space=pltpu.MemorySpace.SMEM)],
        out_specs=(
            pl.BlockSpec(memory_space=pltpu.MemorySpace.VMEM),
            pl.BlockSpec(memory_space=pltpu.MemorySpace.VMEM),
        ),
    )(seed_arr)
    return action, logp[:, 0]


def random_explorer_forward(observation, seed, *, action_dim=8,
                            temperature=1.0, unimix=0.01):
    """Mirrors RandomExplorer.forward: returns ({'action', 'log_probability'}, None)."""
    del observation  # reference forward ignores observation content
    batch = 1        # reference forward hard-codes batch_size = 1
    action, logp = random_explorer_sample(
        seed, batch=batch, action_dim=action_dim,
        temperature=temperature, unimix=unimix)
    return {"action": action, "log_probability": logp}, None


if __name__ == "__main__":
    key = jax.random.PRNGKey(0)
    obs_key, seed_key = jax.random.split(key)

    # Small NCHW-like observation (ignored by the policy, as in the reference).
    observation = jax.random.normal(obs_key, (1, 4, 16, 16), dtype=jnp.float32)
    seed = int(jax.random.randint(seed_key, (), 0, 2**31 - 1))

    action_dim = 8
    policy_output, _ = random_explorer_forward(
        observation, seed, action_dim=action_dim, temperature=1.0, unimix=0.01)
    action = jax.block_until_ready(policy_output["action"])
    logp = jax.block_until_ready(policy_output["log_probability"])

    # Sanity checks: valid one-hot action, uniform log-prob (logits are zeros).
    assert action.shape == (1, action_dim)
    assert logp.shape == (1,)
    assert abs(float(jnp.sum(action)) - 1.0) < 1e-6
    assert abs(float(logp[0]) - math.log(1.0 / action_dim)) < 1e-5

    # Batched sampling path (amortizes the fixed launch cost; B=8 fills one
    # sublane group).  Each row must still be a valid one-hot action.
    actions_b, logp_b = random_explorer_sample(seed, batch=8, action_dim=action_dim)
    actions_b = jax.block_until_ready(actions_b)
    logp_b = jax.block_until_ready(logp_b)
    assert actions_b.shape == (8, action_dim)
    assert bool(jnp.all(jnp.abs(jnp.sum(actions_b, axis=-1) - 1.0) < 1e-6))
    assert bool(jnp.all(jnp.abs(logp_b - math.log(1.0 / action_dim)) < 1e-5))

    print("KERNEL_OK")
</pallas_src>

<mosaic_0001>
module attributes {stable_mosaic.version = 11 : i64} {
  func.func @_random_explorer_kernel(%arg0: memref<1xi32, #tpu.memory_space<smem>>, %arg1: memref<1x8xf32, #tpu.memory_space<vmem>>, %arg2: memref<1x1xf32, #tpu.memory_space<vmem>>) attributes {dimension_semantics = [], scalar_prefetch = 0 : i64, scratch_operands = 0 : i64, tpu.core_type = #tpu.core_type<tc>} {
    %0 = tpu.iota {dimensions = array<i32: 1>} : vector<1x8xi32>
    %1 = tpu.iota {dimensions = array<i32: 0>} : vector<1x8xi32>
    %c-1640531527_i32 = arith.constant -1640531527 : i32
    %2 = vector.broadcast %c-1640531527_i32 : i32 to vector<1x8xi32>
    %3 = arith.muli %1, %2 : vector<1x8xi32>
    %c-2048144789_i32 = arith.constant -2048144789 : i32
    %4 = vector.broadcast %c-2048144789_i32 : i32 to vector<1x8xi32>
    %5 = arith.muli %0, %4 : vector<1x8xi32>
    %6 = arith.addi %3, %5 : vector<1x8xi32>
    %c0 = arith.constant 0 : index
    %7 = memref.load %arg0[%c0] : memref<1xi32, #tpu.memory_space<smem>>
    %c-1028477387_i32 = arith.constant -1028477387 : i32
    %8 = arith.muli %7, %c-1028477387_i32 : i32
    %9 = vector.broadcast %8 : i32 to vector<1x8xi32>
    %10 = arith.addi %6, %9 : vector<1x8xi32>
    %c656542357_i32 = arith.constant 656542357 : i32
    %11 = vector.broadcast %c656542357_i32 : i32 to vector<1x8xi32>
    %12 = arith.addi %10, %11 : vector<1x8xi32>
    %c16_i32 = arith.constant 16 : i32
    %13 = vector.broadcast %c16_i32 : i32 to vector<1x8xi32>
    %14 = arith.shrui %12, %13 : vector<1x8xi32>
    %15 = arith.xori %12, %14 : vector<1x8xi32>
    %c2146121005_i32 = arith.constant 2146121005 : i32
    %16 = vector.broadcast %c2146121005_i32 : i32 to vector<1x8xi32>
    %17 = arith.muli %15, %16 : vector<1x8xi32>
    %c15_i32 = arith.constant 15 : i32
    %18 = vector.broadcast %c15_i32 : i32 to vector<1x8xi32>
    %19 = arith.shrui %17, %18 : vector<1x8xi32>
    %20 = arith.xori %17, %19 : vector<1x8xi32>
    %c-2073254261_i32 = arith.constant -2073254261 : i32
    %21 = vector.broadcast %c-2073254261_i32 : i32 to vector<1x8xi32>
    %22 = arith.muli %20, %21 : vector<1x8xi32>
    %c16_i32_0 = arith.constant 16 : i32
    %23 = vector.broadcast %c16_i32_0 : i32 to vector<1x8xi32>
    %24 = arith.shrui %22, %23 : vector<1x8xi32>
    %25 = arith.xori %22, %24 : vector<1x8xi32>
    %c8_i32 = arith.constant 8 : i32
    %26 = vector.broadcast %c8_i32 : i32 to vector<1x8xi32>
    %27 = arith.shrui %25, %26 : vector<1x8xi32>
    %28 = arith.uitofp %27 : vector<1x8xi32> to vector<1x8xf32>
    %cst = arith.constant 5.96046448E-8 : f32
    %29 = vector.broadcast %cst : f32 to vector<1x8xf32>
    %30 = arith.mulf %28, %29 : vector<1x8xf32>
    %cst_1 = arith.constant 9.99999968E-21 : f32
    %31 = vector.broadcast %cst_1 : f32 to vector<1x8xf32>
    %32 = arith.addf %30, %31 : vector<1x8xf32>
    %33 = math.log %32 : vector<1x8xf32>
    %cst_2 = arith.constant 0.000000e+00 : f32
    %34 = vector.broadcast %cst_2 : f32 to vector<1x8xf32>
    %35 = arith.subf %34, %33 : vector<1x8xf32>
    %cst_3 = arith.constant 9.99999968E-21 : f32
    %36 = vector.broadcast %cst_3 : f32 to vector<1x8xf32>
    %37 = arith.addf %35, %36 : vector<1x8xf32>
    %38 = math.log %37 : vector<1x8xf32>
    %cst_4 = arith.constant 0.000000e+00 : f32
    %39 = vector.broadcast %cst_4 : f32 to vector<1x8xf32>
    %40 = arith.subf %39, %38 : vector<1x8xf32>
    %cst_5 = arith.constant dense<0xFF800000> : vector<1xf32>
    %41 = vector.multi_reduction <maximumf>, %40, %cst_5 [1] : vector<1x8xf32> to vector<1xf32>
    %42 = vector.shape_cast %41 : vector<1xf32> to vector<1x1xf32>
    %43 = vector.broadcast %42 : vector<1x1xf32> to vector<1x8xf32>
    %44 = arith.cmpf oge, %40, %43 : vector<1x8xf32>
    %c8_i32_6 = arith.constant 8 : i32
    %45 = vector.broadcast %c8_i32_6 : i32 to vector<1x8xi32>
    %46 = arith.select %44, %0, %45 : vector<1x8xi1>, vector<1x8xi32>
    %cst_7 = arith.constant dense<2147483647> : vector<1xi32>
    %47 = vector.multi_reduction <minsi>, %46, %cst_7 [1] : vector<1x8xi32> to vector<1xi32>
    %48 = vector.shape_cast %47 : vector<1xi32> to vector<1x1xi32>
    %49 = vector.broadcast %48 : vector<1x1xi32> to vector<1x8xi32>
    %50 = arith.cmpi eq, %0, %49 : vector<1x8xi32>
    %51 = arith.extui %50 : vector<1x8xi1> to vector<1x8xi32>
    %52 = arith.sitofp %51 : vector<1x8xi32> to vector<1x8xf32>
    %c0_8 = arith.constant 0 : index
    %c0_9 = arith.constant 0 : index
    %53 = vector.load %arg1[%c0_8, %c0_9] : memref<1x8xf32, #tpu.memory_space<vmem>>, vector<1x8xf32>
    tpu.vector_store %arg1[%c0_8, %c0_9], %52 {strides = array<i32>} : memref<1x8xf32, #tpu.memory_space<vmem>>, vector<1x8xf32>,
    %cst_10 = arith.constant -2.07944155 : f32
    %54 = vector.broadcast %cst_10 : f32 to vector<1x1xf32>
    %c0_11 = arith.constant 0 : index
    %c0_12 = arith.constant 0 : index
    %55 = vector.load %arg2[%c0_11, %c0_12] : memref<1x1xf32, #tpu.memory_space<vmem>>, vector<1x1xf32>
    tpu.vector_store %arg2[%c0_11, %c0_12], %54 {strides = array<i32>} : memref<1x1xf32, #tpu.memory_space<vmem>>, vector<1x1xf32>,
    return
  }
}

</mosaic_0001>

<bundles_post_ra>
// kernel: tpu_custom_call.1
= control target key start
LH: loop header
LB: loop body
LE: loop exit
PB: predicated region body
PF: predicated region fallthrough
CT: control target
= control target key end

     0   :  { %9 = vsyncpa [#allocation4], 0  ;;  %v13_v0 = vlaneseq  ;;  %s193_s0 = inlined_call_operand.<no memory space> [shape: s32[1], index: 0, kind: input, shape index: {}]   ;;  %s194_s1 = inlined_call_operand.hbm [shape: f32[1,8], index: 1, kind: output, shape index: {0}]   ;;  %s195_s2 = inlined_call_operand.hbm [shape: f32[1,1], index: 2, kind: output, shape index: {1}]  }
   0x1   :  { %10 = vsyncpa [#allocation6], 0  ;;  %s21_s11 = smul.u32 3266489909, %s193_s0  ;;  %vm49_vm0 = vcmask 57344   ;;  %vm74_vm3 = vcmask 0  }
   0x2   :  { %v179_v1 = vand.u32 127, %v13_v0  ;;  %v16_v2 = vshrl.u32 %v13_v0, 7  ;;  %s157_s0 = smov [#allocation5]   ;;  %v158_v43 = vmov -2.0794415  }
   0x3   :  { %v22_v5 = vstv %s21_s11  ;;  %s92_s12 = sshll.u32 %s157_s0, 4  ;;  %75 = vst.msk [vmem:[#allocation5] sm:$0x1] %vm74_vm3, %v158_v43  ;;  %s93_s12 = int_to_ptr.vmem [resolvable:$true] %s92_s12 }
   0x4   :  { %v17_v3 = vmul.u32 2654435769, %v16_v2  ;;  %v18_v4 = vmul.u32 2246822507, %v179_v1  ;;  %s113_s13 = scalar_lea.vmem %s93_s12, 16  ;;  %s117_s14 = scalar_lea.vmem %s93_s12, 32 }
   0x5   :  { %p114_p0 = scmp.ne.s32.totalorder %s93_s12, %s113_s13  ;;  %p118_p1 = scmp.lt.s32.totalorder %s93_s12, %s93_s12 }
   0x6   :  { %v19_v6 = vadd.s32 %v18_v4, %v17_v3  ;;  %p119_p2 = scmp.lt.s32.totalorder %s117_s14, %s113_s13 }
   0x8   :  { %v23_v7 = vadd.s32 %v22_v5, %v19_v6  ;;  %p120_p3 = por %p119_p2, %p118_p1 }
   0xa   :  { %v24_v8 = vadd.s32 656542357, %v23_v7  ;;  %p121_p4 = pnand %p120_p3, %p114_p0 }
   0xc   :  { %v25_v9 = vshrl.u32 %v24_v8, 16 }
   0xe   :  { %v26_v10 = vxor.u32 %v25_v9, %v24_v8 }
  0x10   :  { %v27_v11 = vmul.u32 2146121005, %v26_v10 }
  0x12   :  { %v28_v12 = vshrl.u32 %v27_v11, 15 }
  0x14   :  { %v29_v13 = vxor.u32 %v28_v12, %v27_v11 }
  0x16   :  { %v30_v14 = vmul.u32 2221713035, %v29_v13 }
  0x18   :  { %v31_v15 = vshrl.u32 %v30_v14, 16 }
  0x1a   :  { %v32_v16 = vxor.u32 %v31_v15, %v30_v14 }
  0x1c   :  { %v33_v17 = vshrl.u32 %v32_v16, 8 }
  0x1e   :  { %v34_v18 = vshrl.u32 %v33_v17, 16  ;;  %v35_v19 = vand.u32 65535, %v33_v17 }
  0x20   :  { %v36_v20 = vcvt.s32.f32 %v34_v18  ;;  %v38_v21 = vcvt.s32.f32 %v35_v19 }
  0x22   :  { %v37_v22 = vmul.f32 65536.0, %v36_v20 }
  0x24   :  { %v39_v23 = vadd.f32 %v38_v21, %v37_v22 }
  0x26   :  { %v40_v24 = vmul.f32 5.9604645e-08, %v39_v23 }
  0x28   :  { %v41_v25 = vadd.f32 1e-20, %v40_v24 }
  0x2a   :  { %109 = vlog2.f32 %v41_v25 }
  0x37   :  { %v110_v26 = vpop.eup %109 }
  0x38   :  { %v43_v27 = vmul.f32 0.6931472, %v110_v26 }
  0x3a   :  { %v44_v28 = vsub.f32 0.0, %v43_v27 }
  0x3c   :  { %v45_v29 = vadd.f32 1e-20, %v44_v28 }
  0x3e   :  { %111 = vlog2.f32 %v45_v29 }
  0x4b   :  { %v112_v30 = vpop.eup %111 }
  0x4c   :  { %v47_v31 = vmul.f32 0.6931472, %v112_v30 }
  0x4e   :  { %v48_v32 = vsub.f32 0.0, %v47_v31 }
  0x50   :  { %v50_v33 = vsel %vm49_vm0, %v48_v32, -inf }
  0x51   :  { %51 = vmax.xlane.f32.xlu0 %v50_v33 }
  0xda   :  { %v52_v34 = vpop.xlane.xlu0 %51 }
  0xdb   :  { %vm53_vm1 = vcmp.ge.f32.partialorder %v48_v32, %v52_v34 }
  0xdc   :  { %v54_v35 = vsel %vm53_vm1, %v179_v1, 8 }
  0xdd   :  { %v55_v36 = vsel %vm49_vm0, %v54_v35, 2147483647 }
  0xde   :  { %v57_v37 = vshra.s32 %v55_v36, 16  ;;  %v56_v39 = vand.u32 65535, %v55_v36 }
  0xe0   :  { %v59_v38 = vcvt.s32.f32 %v57_v37  ;;  %v58_v41 = vcvt.s32.f32 %v56_v39 }
  0xe2   :  { %60 = vmin.xlane.f32.xlu0 %v59_v38 }
 0x16b   :  { %v61_v40 = vpop.xlane.xlu0 %60 }
 0x16c   :  { %vm62_vm2 = vcmp.eq.f32.partialorder %v59_v38, %v61_v40 }
 0x16d   :  { %v63_v42 = vsel %vm62_vm2, %v58_v41, inf }
 0x16e   :  { %64 = vmin.xlane.f32.xlu1 %v63_v42 }
 0x16f   :  { %124 = shalt.err (!%p121_p4)
}
 0x170   :  { %95 = dma.vmem_to_hbm [thread:$0]  %s93_s12, 16, %s195_s2, [#allocation6]   ;;  %v67_v44 = vcvt.f32.s32 %v61_v40  ;;  %v160_v49 = vmov 0.0  }
 0x171   :  { %s159_s17 = smov [#allocation3]  }
 0x172   :  { %v68_v46 = vshll.u32 %v67_v44, 16  ;;  %s82_s18 = sshll.u32 %s159_s17, 4  ;;  %s83_s18 = int_to_ptr.vmem [resolvable:$true] %s82_s18 }
 0x173   :  { %s133_s19 = scalar_lea.vmem %s83_s18, 16  ;;  %s137_s20 = scalar_lea.vmem %s83_s18, 32 }
 0x174   :  { %p134_p5 = scmp.ne.s32.totalorder %s83_s18, %s133_s19  ;;  %p138_p6 = scmp.lt.s32.totalorder %s83_s18, %s83_s18 }
 0x175   :  { %p139_p7 = scmp.lt.s32.totalorder %s137_s20, %s133_s19 }
 0x177   :  { %p140_p8 = por %p139_p7, %p138_p6 }
 0x179   :  { %p141_p9 = pnand %p140_p8, %p134_p5 }
 0x1f7   :  { %v65_v45 = vpop.xlane.xlu1 %64 }
 0x1f8   :  { %v66_v47 = vcvt.f32.s32 %v65_v45 }
 0x1fa   :  { %v69_v48 = vadd.s32 %v68_v46, %v66_v47 }
 0x1fc   :  { %vm70_vm4 = vcmp.eq.s32.totalorder %v179_v1, %v69_v48 }
 0x1fd   :  { %v104_v50 = vsel %vm70_vm4, 1.0, %v160_v49 }
 0x1fe   :  { %73 = vst.msk [vmem:[#allocation3] sm:$0x1] %vm49_vm0, %v104_v50 }
 0x1ff   :  { %144 = shalt.err (!%p141_p9)
}
 0x200   :  { %85 = dma.vmem_to_hbm [thread:$0]  %s83_s18, 16, %s194_s1, [#allocation4]  }
 0x201   :  { %153 = dma.done.wait [#allocation4], 16  }
 0x202   :  { %154 = vsyncadd [#allocation4], 4294967280 }
 0x203   :  { %155 = dma.done.wait [#allocation6], 16  }
 0x204   :  { %156 = vsyncadd [#allocation6], 4294967280 }
 0x205   :  { %102 = vsyncpa [#allocation4], 1 }
 0x206   :  { %103 = vsyncpa [#allocation6], 1 }

</bundles_post_ra>
